<compile_context>
chip_gen: v5e
topology: v5e:2x2
jax: 0.10.0
libtpu: 0.0.40
codegen_flags: <defaults>
</compile_context>

<pallas_src>
import math

import jax
import jax.numpy as jnp
from jax.experimental import pallas as pl
from jax.experimental.pallas import tpu as pltpu

_VMEM_BUDGET = 24 * 1024 * 1024   # pipeline working-set target (v7x headroom)
_VMEM_LIMIT = 32 * 1024 * 1024    # scoped VMEM limit handed to Mosaic
_MAX_TM = 2048                    # amortize per-grid-step overhead (skinny Din)
_MIN_TM = 8                       # sublane granularity


def _round_up(x, m):
    return ((x + m - 1) // m) * m


def _linear_relu_kernel(x_ref, w_ref, b_ref, o_ref):
    # x_ref: (TM, Din) native dtype, w_ref: (Din, Dout) f32,
    # b_ref: (1, Dout) f32, o_ref: (TM, Dout) f32
    x = x_ref[...].astype(jnp.float32)  # torch `.float()` fused into the kernel
    acc = jnp.dot(x, w_ref[...], preferred_element_type=jnp.float32)
    o_ref[...] = jnp.maximum(acc + b_ref[...], 0.0)


def _pick_tm(batch, d_in, d_out, x_itemsize):
    """Batch-tile rows from a VMEM budget + a >=2-step split for v7x's 2 TCs."""
    if batch <= _MIN_TM:
        return batch  # block == full array dim along batch (always legal)
    # Double-buffered x and out tiles; weight/bias are small and resident.
    fixed = 2 * (d_in * d_out * 4 + d_out * 4)
    per_row = 2 * d_in * x_itemsize + 2 * d_out * 4
    tm_budget = max(_MIN_TM,
                    ((_VMEM_BUDGET - fixed) // per_row) // _MIN_TM * _MIN_TM)
    # Aim for at least 2 grid iterations so both v7x TensorCores get work.
    tm_split = max(_MIN_TM, _round_up(pl.cdiv(batch, 2), _MIN_TM))
    return int(min(_MAX_TM, tm_budget, tm_split))


def linear_relu(x, w_t, b2d):
    """relu(x.astype(f32) @ w_t + b) with a batch-tiled Pallas TPU kernel.

    x:    (B, Din), any real dtype (cast to f32 inside the kernel)
    w_t:  (Din, Dout) float32
    b2d:  (1, Dout) float32
    returns (B, Dout) float32
    """
    B, Din = x.shape
    Dout = w_t.shape[1]
    tm = _pick_tm(B, Din, Dout, x.dtype.itemsize)

    return pl.pallas_call(
        _linear_relu_kernel,
        out_shape=jax.ShapeDtypeStruct((B, Dout), jnp.float32),
        grid_spec=pl.GridSpec(
            grid=(pl.cdiv(B, tm),),                            # ragged last block masked
            in_specs=[
                pl.BlockSpec((tm, Din), lambda i: (i, 0)),     # streamed batch tiles
                pl.BlockSpec((Din, Dout), lambda i: (0, 0)),   # resident weight
                pl.BlockSpec((1, Dout), lambda i: (0, 0)),     # resident bias
            ],
            out_specs=pl.BlockSpec((tm, Dout), lambda i: (i, 0)),
        ),
        compiler_params=pltpu.CompilerParams(
            # independent batch tiles -> shard across TCs on v7x
            dimension_semantics=("parallel",),
            vmem_limit_bytes=_VMEM_LIMIT,
        ),
    )(x, w_t, b2d)


def xavier_uniform(key, shape, gain):
    # shape = (fan_out, fan_in) to match nn.Linear.weight layout
    fan_out, fan_in = shape
    bound = gain * math.sqrt(6.0 / (fan_in + fan_out))
    return jax.random.uniform(key, shape, jnp.float32, -bound, bound)


class NetworkPallas:
    """JAX/Pallas equivalent of the PyTorch `Network` module."""

    def __init__(self, input_shape, output_shape, key):
        n_input = input_shape[-1]
        n_output = output_shape[0]
        self.n_input = n_input
        self.n_output = n_output

        k_w, k_b = jax.random.split(key)
        gain = math.sqrt(2.0)  # nn.init.calculate_gain('relu')
        # nn.Linear.weight has shape (n_output, n_input).
        # NOTE: JAX PRNG init matches the PyTorch module in distribution only.
        self.weight = xavier_uniform(k_w, (n_output, n_input), gain)
        # nn.Linear default bias init: U(-1/sqrt(fan_in), 1/sqrt(fan_in))
        bb = 1.0 / math.sqrt(n_input)
        self.bias = jax.random.uniform(k_b, (n_output,), jnp.float32, -bb, bb)

        # Kernel-layout params computed ONCE: W^T (Din, Dout) and 2-D bias.
        # No output-feature padding: the (tm, n_output) output block's last dim
        # equals the full array dim (legal), keeping HBM traffic minimal.
        self.weight_t = jnp.asarray(self.weight.T)        # (n_input, n_output)
        self.bias2d = self.bias.reshape(1, n_output)      # (1, n_output)

    def __call__(self, state):
        # torch.squeeze(state, 1): drop dim 1 iff it is size 1
        if state.ndim >= 2 and state.shape[1] == 1:
            x = jnp.squeeze(state, axis=1)
        else:
            x = state
        # The float32 cast happens inside the kernel (no extra HBM pass here).
        return linear_relu(x, self.weight_t, self.bias2d)


if __name__ == "__main__":
    key = jax.random.PRNGKey(0)
    k_param, k_in = jax.random.split(key)

    batch = 8
    n_input = 32
    n_output = 16
    input_shape = (n_input,)
    output_shape = (n_output,)

    net = NetworkPallas(input_shape, output_shape, k_param)

    # state: (batch, 1, n_input) — the singleton dim-1 is squeezed in forward
    state = jax.random.normal(k_in, (batch, 1, n_input), dtype=jnp.float32)

    out = net(state)
    out = jax.block_until_ready(out)

    # reference check in plain JAX
    ref = jnp.maximum(jnp.squeeze(state, 1).astype(jnp.float32) @ net.weight.T
                      + net.bias, 0.0)
    assert out.shape == (batch, n_output), out.shape
    assert jnp.allclose(out, ref, atol=1e-5, rtol=1e-5), float(
        jnp.max(jnp.abs(out - ref)))

    print("KERNEL_OK")
</pallas_src>

<mosaic_0001>
module attributes {stable_mosaic.version = 11 : i64} {
  func.func @_linear_relu_kernel(%arg0: i32, %arg1: memref<8x32xf32, #tpu.memory_space<vmem>>, %arg2: memref<32x16xf32, #tpu.memory_space<vmem>>, %arg3: memref<1x16xf32, #tpu.memory_space<vmem>>, %arg4: memref<8x16xf32, #tpu.memory_space<vmem>>) attributes {dimension_semantics = [#tpu.dimension_semantics<parallel>], iteration_bounds = array<i64: 1>, scalar_prefetch = 0 : i64, scratch_operands = 0 : i64, tpu.core_type = #tpu.core_type<tc>, window_params = [{transform_indices = @transform_0, window_bounds = array<i64: 8, 32>}, {pipeline_mode = #tpu.pipeline_mode<synchronous>, transform_indices = @transform_1, window_bounds = array<i64: 32, 16>}, {pipeline_mode = #tpu.pipeline_mode<synchronous>, transform_indices = @transform_2, window_bounds = array<i64: 1, 16>}, {transform_indices = @transform_3, window_bounds = array<i64: 8, 16>}]} {
    %c0 = arith.constant 0 : index
    %c0_0 = arith.constant 0 : index
    %0 = vector.load %arg1[%c0, %c0_0] : memref<8x32xf32, #tpu.memory_space<vmem>>, vector<8x32xf32>
    %c0_1 = arith.constant 0 : index
    %c0_2 = arith.constant 0 : index
    %1 = vector.load %arg2[%c0_1, %c0_2] : memref<32x16xf32, #tpu.memory_space<vmem>>, vector<32x16xf32>
    %cst = arith.constant dense<0.000000e+00> : vector<8x16xf32>
    %2 = tpu.matmul %0, %1, %cst {dimension_numbers = #tpu.dot_dimension_numbers<[1], [0], [0], [1], [0, 0, 1, 1], [], []>} : vector<8x32xf32>, vector<32x16xf32>, vector<8x16xf32> -> vector<8x16xf32>
    %c0_3 = arith.constant 0 : index
    %c0_4 = arith.constant 0 : index
    %3 = vector.load %arg3[%c0_3, %c0_4] : memref<1x16xf32, #tpu.memory_space<vmem>>, vector<1x16xf32>
    %4 = vector.broadcast %3 : vector<1x16xf32> to vector<8x16xf32>
    %5 = arith.addf %2, %4 : vector<8x16xf32>
    %cst_5 = arith.constant 0.000000e+00 : f32
    %6 = vector.broadcast %cst_5 : f32 to vector<8x16xf32>
    %7 = arith.maximumf %5, %6 : vector<8x16xf32>
    %c0_6 = arith.constant 0 : index
    %c0_7 = arith.constant 0 : index
    %8 = vector.load %arg4[%c0_6, %c0_7] : memref<8x16xf32, #tpu.memory_space<vmem>>, vector<8x16xf32>
    tpu.vector_store %arg4[%c0_6, %c0_7], %7 {strides = array<i32>} : memref<8x16xf32, #tpu.memory_space<vmem>>, vector<8x16xf32>,
    return
  }
  func.func @transform_0(%arg0: i32) -> (i32, i32) {
    %c0_i32 = arith.constant 0 : i32
    %c0_i32_0 = arith.constant 0 : i32
    return %arg0, %c0_i32 : i32, i32
  }
  func.func @transform_1(%arg0: i32) -> (i32, i32) {
    %c0_i32 = arith.constant 0 : i32
    %c0_i32_0 = arith.constant 0 : i32
    %c0_i32_1 = arith.constant 0 : i32
    return %c0_i32, %c0_i32_0 : i32, i32
  }
  func.func @transform_2(%arg0: i32) -> (i32, i32) {
    %c0_i32 = arith.constant 0 : i32
    %c0_i32_0 = arith.constant 0 : i32
    %c0_i32_1 = arith.constant 0 : i32
    return %c0_i32, %c0_i32_0 : i32, i32
  }
  func.func @transform_3(%arg0: i32) -> (i32, i32) {
    %c0_i32 = arith.constant 0 : i32
    %c0_i32_0 = arith.constant 0 : i32
    return %arg0, %c0_i32 : i32, i32
  }
}

</mosaic_0001>

<bundles_post_ra>
// kernel: tpu_custom_call.1
= control target key start
LH: loop header
LB: loop body
LE: loop exit
PB: predicated region body
PF: predicated region fallthrough
CT: control target
= control target key end

     0   :  { %s138_s0 = inlined_call_operand.vmem [shape: f32[8,32], index: 0, kind: input, shape index: {}]   ;;  %s139_s1 = inlined_call_operand.vmem [shape: f32[32,16], index: 1, kind: input, shape index: {}]   ;;  %s140_s2 = inlined_call_operand.vmem [shape: f32[1,16], index: 2, kind: input, shape index: {}]   ;;  %s141_s3 = inlined_call_operand.hbm [shape: f32[8,16], index: 3, kind: output, shape index: {}]  }
   0x1   :  { %v19_v0 = vld [vmem:[%s139_s1 + $0x18] sm:$0xff]  ;;  %v18_v1 = vld [vmem:[%s139_s1 + $0x10] sm:$0xff]  ;;  %v17_v2 = vld [vmem:[%s139_s1 + $0x8] sm:$0xff] }
   0x2   :  { %40 = vmatpush.msra.mxu0 %v19_v0 }
   0x3   :  { %8 = vsyncpa [#allocation3], 0  ;;  %v16_v3 = vld [vmem:[%s139_s1] sm:$0xff]  ;;  %vm24_vm0 = vcmask 261120   ;;  %s96_s24 = smov [#allocation2]   ;;  %s58_s28 = sshll.u32 %s141_s3, 4  ;;  %s59_s28 = int_to_ptr.hbm [resolvable:$true] %s58_s28 }
   0x4   :  { %41 = vmatpush.msra.mxu0 %v18_v1  ;;  %v15_v4 = vld [vmem:[%s138_s0] sm:$0xff]  ;;  %s56_s25 = sshll.u32 %s96_s24, 4  ;;  %vm49_vm1 = vcmask 130048   ;;  %s57_s25 = int_to_ptr.vmem [resolvable:$true] %s56_s25 }
   0x5   :  { %v69_v5 = vld [vmem:[%s140_s2] ss:$0 sm:$0xff] }
   0x6   :  { %42 = vmatpush.msra.mxu0 %v17_v2 }
   0x8   :  { %43 = vmatpush.msra.mxu0 %v16_v3 }
   0x9   :  { %67 = vmatmul.msk.f32.vlgmr.msra.gmra.mxu0 %vm24_vm0, %v15_v4 }
  0x86   :  { %v45_v6 = vpop.f32.mrf.mxu0 }
  0x87   :  { %v46_v7 = vadd.f32 %v69_v5, %v45_v6 }
  0x89   :  { %v48_v8 = vmax.f32 %v46_v7, 0.0 }
  0x8b   :  { %50 = vst.msk [vmem:[#allocation2] sm:$0xff] %vm49_vm1, %v48_v8 }
  0x8c   :  { %61 = dma.vmem_to_hbm [thread:$0]  %s57_s25, 128, %s59_s28, [#allocation3]  }
  0x8d   :  { %94 = dma.done.wait [#allocation3], 128  }
  0x8e   :  { %95 = vsyncadd [#allocation3], 4294967168 }
  0x8f   :  { %66 = vsyncpa [#allocation3], 1 }

</bundles_post_ra>
